<compile_context>
chip_gen: v6e
topology: v6e:2x2x1
jax: 0.10.0
libtpu: 0.0.40
codegen_flags: <defaults>
</compile_context>

<pallas_src>
import functools

import jax
import jax.numpy as jnp
from jax.experimental import pallas as pl
from jax.experimental.pallas import tpu as pltpu


def _round_up(n, m):
    return ((n + m - 1) // m) * m


def _log_sigmoid(x):
    # numerically stable log(sigmoid(x)) = min(x, 0) - log1p(exp(-|x|))
    return jnp.minimum(x, 0.0) - jnp.log1p(jnp.exp(-jnp.abs(x)))


# ----------------------------------------------------------------------------
# Kernel 1: image encoder (stand-in for LSTMEncoder): tanh(x @ W + b)
#   grid = (rows, K-chunks); bf16 inputs, f32 accumulator in VMEM scratch,
#   init on k==0, tanh+store on the last K step.  Output lane dim is a full
#   multiple of 128 -> unmasked vst.  dimension_semantics = (parallel,
#   arbitrary) so the M axis is megacore-sharded on v7x.
# ----------------------------------------------------------------------------
def _encoder_kernel(x_ref, w_ref, b_ref, o_ref, acc_ref):
    k = pl.program_id(1)

    @pl.when(k == 0)
    def _():
        acc_ref[...] = jnp.zeros_like(acc_ref)

    acc_ref[...] += jnp.dot(x_ref[...], w_ref[...],
                            preferred_element_type=jnp.float32)

    @pl.when(k == pl.num_programs(1) - 1)
    def _():
        o_ref[...] = jnp.tanh(acc_ref[...] + b_ref[...])


def encoder_forward(x_bf16, w_bf16, b_f32, *, tm=None, tk=None):
    """x: (N, F) bf16, w: (F, Dp) bf16 (Dp % 128 == 0), b: (1, Dp) f32."""
    n, f = x_bf16.shape
    dp = w_bf16.shape[1]                      # already a multiple of 128
    tm = tm or min(128, _round_up(n, 8))      # 128-aligned for big N
    tk = tk or min(512, _round_up(f, 128))
    n_pad = _round_up(n, tm)
    f_pad = _round_up(f, tk)
    x_p = jnp.pad(x_bf16, ((0, n_pad - n), (0, f_pad - f)))
    w_p = jnp.pad(w_bf16, ((0, f_pad - f), (0, 0)))

    # VMEM budget (double-buffered): 2*(tm*tk + tk*dp)*2B + tm*dp*(4+8)B — well
    # under the 32 MiB scoped default even on v7x for these tile sizes.
    out = pl.pallas_call(
        _encoder_kernel,
        out_shape=jax.ShapeDtypeStruct((n_pad, dp), jnp.float32),
        grid_spec=pltpu.PrefetchScalarGridSpec(
            num_scalar_prefetch=0,
            grid=(n_pad // tm, f_pad // tk),
            in_specs=[
                pl.BlockSpec((tm, tk), lambda i, k: (i, k)),
                pl.BlockSpec((tk, dp), lambda i, k: (k, 0)),
                pl.BlockSpec((1, dp), lambda i, k: (0, 0)),
            ],
            out_specs=pl.BlockSpec((tm, dp), lambda i, k: (i, 0)),
            scratch_shapes=[pltpu.VMEM((tm, dp), jnp.float32)],
        ),
        compiler_params=pltpu.CompilerParams(
            dimension_semantics=("parallel", "arbitrary")),
    )(x_p, w_p, b_f32)
    return out[:n]


# ----------------------------------------------------------------------------
# Kernel 2: VCWE score / loss, tiled over the batch.
#   Per-tile partial sums are accumulated into (1,1) VMEM scratch; the image
#   dot is accumulated RAW across tiles and logsigmoid is applied only at the
#   final step (matching torch.sum(...) before nn.LogSigmoid in the reference).
# ----------------------------------------------------------------------------
def _vcwe_score_kernel(u_ref, pv_ref, imgp_ref, nv_ref, imgn_ref,
                       o_ref, acc_main, acc_img, *, batch_size):
    i = pl.program_id(0)
    tb = u_ref.shape[0]

    @pl.when(i == 0)
    def _():
        acc_main[...] = jnp.zeros_like(acc_main)
        acc_img[...] = jnp.zeros_like(acc_img)

    u = u_ref[...]            # (tb, Dp)
    pv = pv_ref[...]          # (tb, Dp)
    ip = imgp_ref[...]        # (tb, Dp)
    nv = nv_ref[...]          # (tb, neg, Dp)
    im = imgn_ref[...]        # (tb, neg, Dp)

    # Mask rows that are pure batch padding.
    row = i * tb + jax.lax.broadcasted_iota(jnp.int32, (tb, 1), 0)
    valid = (row < batch_size).astype(jnp.float32)            # (tb, 1)

    # score = -logsigmoid(sum(u * pos_v, dim=1)); torch.mean over batch later
    pos_dot = jnp.sum(u * pv, axis=1, keepdims=True)           # (tb, 1)
    score_sum = jnp.sum(-_log_sigmoid(pos_dot) * valid, keepdims=True)

    # img_score = -logsigmoid( sum over ALL elements of u * img_pos )
    # -> accumulate the raw global dot; apply logsigmoid at the last step.
    img_dot = jnp.sum(u * ip * valid, keepdims=True)           # (1, 1)

    # neg_score / img_neg_score = sum over batch & neg of -logsigmoid(-dot)
    u3 = u[:, None, :]                                         # (tb, 1, Dp)
    neg_dot = jnp.sum(nv * u3, axis=-1)                        # (tb, neg)
    neg_sum = jnp.sum(-_log_sigmoid(-neg_dot) * valid, keepdims=True)

    imgneg_dot = jnp.sum(im * u3, axis=-1)                     # (tb, neg)
    imgneg_sum = jnp.sum(-_log_sigmoid(-imgneg_dot) * valid, keepdims=True)

    acc_main[...] += score_sum * (1.0 / batch_size) + neg_sum + imgneg_sum
    acc_img[...] += img_dot

    @pl.when(i == pl.num_programs(0) - 1)
    def _():
        # mean(score + img_score + neg_score + img_neg_score)
        #   == mean(score) + img_score + neg_score + img_neg_score
        o_ref[...] = acc_main[...] - _log_sigmoid(acc_img[...])


def vcwe_score(embed_u, embed_pos_v, img_pos, embed_neg_v, img_neg):
    bs, dp = embed_u.shape
    neg = embed_neg_v.shape[1]
    tb = min(128, _round_up(bs, 8))
    bs_pad = _round_up(bs, tb)

    pad2 = lambda x: jnp.pad(x, ((0, bs_pad - bs), (0, 0)))
    pad3 = lambda x: jnp.pad(x, ((0, bs_pad - bs), (0, 0), (0, 0)))
    u, pv, ip = pad2(embed_u), pad2(embed_pos_v), pad2(img_pos)
    nv, im = pad3(embed_neg_v), pad3(img_neg)

    kernel = functools.partial(_vcwe_score_kernel, batch_size=bs)
    out = pl.pallas_call(
        kernel,
        out_shape=jax.ShapeDtypeStruct((1, 1), jnp.float32),
        grid_spec=pltpu.PrefetchScalarGridSpec(
            num_scalar_prefetch=0,
            grid=(bs_pad // tb,),
            in_specs=[
                pl.BlockSpec((tb, dp), lambda i: (i, 0)),
                pl.BlockSpec((tb, dp), lambda i: (i, 0)),
                pl.BlockSpec((tb, dp), lambda i: (i, 0)),
                pl.BlockSpec((tb, neg, dp), lambda i: (i, 0, 0)),
                pl.BlockSpec((tb, neg, dp), lambda i: (i, 0, 0)),
            ],
            # (1,1) scalar output in VMEM: one masked store, accepted knowingly.
            out_specs=pl.BlockSpec((1, 1), lambda i: (0, 0)),
            scratch_shapes=[pltpu.VMEM((1, 1), jnp.float32),
                            pltpu.VMEM((1, 1), jnp.float32)],
        ),
        compiler_params=pltpu.CompilerParams(
            dimension_semantics=("arbitrary",)),
    )(u, pv, ip, nv, im)
    return out[0, 0]


# ----------------------------------------------------------------------------
# Wrapper: parameters + full forward (embedding gathers are plain-JAX glue)
# ----------------------------------------------------------------------------
def init_params(key, n_vocab, encode_dim, feat_dim):
    k1, k2, k3, k4 = jax.random.split(key, 4)
    u_table = jax.random.normal(k1, (n_vocab, encode_dim), jnp.float32) * 0.1
    v_table = jax.random.normal(k2, (n_vocab, encode_dim), jnp.float32) * 0.1
    w_enc = jax.random.normal(k3, (feat_dim, encode_dim), jnp.float32) * 0.05
    b_enc = jax.random.normal(k4, (1, encode_dim), jnp.float32) * 0.05
    return u_table, v_table, w_enc, b_enc


def vcwe_forward(params, pos_u, pos_v, pos_img, neg_v, neg_img, neg_size):
    u_table, v_table, w_enc, b_enc = params
    bs = pos_u.shape[0]
    d = u_table.shape[1]
    dp = _round_up(d, 128)        # lane-dense feature dim (zero pad: loss unchanged)
    pad_d = dp - d

    # nn.Embedding lookups (glue) + zero-pad the lane dim
    embed_u = jnp.pad(jnp.take(u_table, pos_u, axis=0), ((0, 0), (0, pad_d)))
    embed_pos_v = jnp.pad(jnp.take(v_table, pos_v, axis=0), ((0, 0), (0, pad_d)))
    embed_neg_v = jnp.take(v_table, neg_v.reshape(-1), axis=0)
    embed_neg_v = embed_neg_v.reshape(bs, neg_size, d)
    embed_neg_v = jnp.pad(embed_neg_v, ((0, 0), (0, 0), (0, pad_d)))

    # Image encoder: ONE fused Pallas launch for positive + negative images
    # (taller M, weights DMA'd once).
    n_pos = bs
    n_neg = neg_img.shape[0]
    x_all = jnp.concatenate(
        [pos_img.reshape(n_pos, -1), neg_img.reshape(n_neg, -1)], axis=0)
    w_pad = jnp.pad(w_enc, ((0, 0), (0, pad_d))).astype(jnp.bfloat16)
    b_pad = jnp.pad(b_enc, ((0, 0), (0, pad_d))).astype(jnp.float32)
    img_all = encoder_forward(x_all.astype(jnp.bfloat16), w_pad, b_pad)
    img_pos = img_all[:n_pos]                                   # (bs, dp)
    img_neg = img_all[n_pos:].reshape(bs, neg_size, dp)         # (bs, neg, dp)

    # score / loss (Pallas kernel)
    return vcwe_score(embed_u, embed_pos_v, img_pos, embed_neg_v, img_neg)


if __name__ == "__main__":
    # Small, deterministic example shapes
    bs = 2
    n_vocab = 50
    encode_dim = 32
    neg_size = 5
    char_seq = 8         # number of character images per word
    img_h = img_w = 16
    feat_dim = char_seq * img_h * img_w

    key = jax.random.PRNGKey(0)
    kp, ku, kv, kn, ki1, ki2 = jax.random.split(key, 6)

    params = init_params(kp, n_vocab, encode_dim, feat_dim)

    pos_u = jax.random.randint(ku, (bs,), 0, n_vocab, dtype=jnp.int32)
    pos_v = jax.random.randint(kv, (bs,), 0, n_vocab, dtype=jnp.int32)
    neg_v = jax.random.randint(kn, (bs, neg_size), 0, n_vocab, dtype=jnp.int32)
    pos_img = jax.random.normal(ki1, (bs, char_seq, img_h, img_w), jnp.float32)
    neg_img = jax.random.normal(ki2, (bs * neg_size, char_seq, img_h, img_w),
                                jnp.float32)

    loss = vcwe_forward(params, pos_u, pos_v, pos_img, neg_v, neg_img, neg_size)
    loss = jax.block_until_ready(loss)
    assert loss.shape == () and bool(jnp.isfinite(loss))
    print("KERNEL_OK")
</pallas_src>

<mosaic_0001>
module attributes {stable_mosaic.version = 11 : i64} {
  func.func @_encoder_kernel(%arg0: i32, %arg1: i32, %arg2: memref<16x512xbf16, #tpu.memory_space<vmem>>, %arg3: memref<512x128xbf16, #tpu.memory_space<vmem>>, %arg4: memref<1x128xf32, #tpu.memory_space<vmem>>, %arg5: memref<16x128xf32, #tpu.memory_space<vmem>>, %arg6: memref<16x128xf32, #tpu.memory_space<vmem>>) attributes {dimension_semantics = [#tpu.dimension_semantics<parallel>, #tpu.dimension_semantics<arbitrary>], iteration_bounds = array<i64: 1, 4>, scalar_prefetch = 0 : i64, scratch_operands = 1 : i64, tpu.core_type = #tpu.core_type<tc>, window_params = [{transform_indices = @transform_0, window_bounds = array<i64: 16, 512>}, {transform_indices = @transform_1, window_bounds = array<i64: 512, 128>}, {pipeline_mode = #tpu.pipeline_mode<synchronous>, transform_indices = @transform_2, window_bounds = array<i64: 1, 128>}, {transform_indices = @transform_3, window_bounds = array<i64: 16, 128>}]} {
    %c0_i32 = arith.constant 0 : i32
    %0 = arith.cmpi eq, %arg1, %c0_i32 : i32
    %1 = arith.extui %0 : i1 to i32
    %c0_i32_0 = arith.constant 0 : i32
    %2 = arith.cmpi ne, %1, %c0_i32_0 : i32
    scf.if %2 {
      %cst_9 = arith.constant 0.000000e+00 : f32
      %12 = vector.broadcast %cst_9 : f32 to vector<16x128xf32>
      %c0_10 = arith.constant 0 : index
      %c0_11 = arith.constant 0 : index
      %13 = vector.load %arg6[%c0_10, %c0_11] : memref<16x128xf32, #tpu.memory_space<vmem>>, vector<16x128xf32>
      tpu.vector_store %arg6[%c0_10, %c0_11], %12 {strides = array<i32>} : memref<16x128xf32, #tpu.memory_space<vmem>>, vector<16x128xf32>,
    } else {
    }
    %c0 = arith.constant 0 : index
    %c0_1 = arith.constant 0 : index
    %3 = vector.load %arg6[%c0, %c0_1] : memref<16x128xf32, #tpu.memory_space<vmem>>, vector<16x128xf32>
    %c0_2 = arith.constant 0 : index
    %c0_3 = arith.constant 0 : index
    %4 = vector.load %arg2[%c0_2, %c0_3] : memref<16x512xbf16, #tpu.memory_space<vmem>>, vector<16x512xbf16>
    %c0_4 = arith.constant 0 : index
    %c0_5 = arith.constant 0 : index
    %5 = vector.load %arg3[%c0_4, %c0_5] : memref<512x128xbf16, #tpu.memory_space<vmem>>, vector<512x128xbf16>
    %cst = arith.constant dense<0.000000e+00> : vector<16x128xf32>
    %6 = tpu.matmul %4, %5, %cst {dimension_numbers = #tpu.dot_dimension_numbers<[1], [0], [0], [1], [0, 0, 1, 1], [], []>} : vector<16x512xbf16>, vector<512x128xbf16>, vector<16x128xf32> -> vector<16x128xf32>
    %7 = arith.addf %3, %6 : vector<16x128xf32>
    %c0_6 = arith.constant 0 : index
    %c0_7 = arith.constant 0 : index
    %8 = vector.load %arg6[%c0_6, %c0_7] : memref<16x128xf32, #tpu.memory_space<vmem>>, vector<16x128xf32>
    tpu.vector_store %arg6[%c0_6, %c0_7], %7 {strides = array<i32>} : memref<16x128xf32, #tpu.memory_space<vmem>>, vector<16x128xf32>,
    %c3_i32 = arith.constant 3 : i32
    %9 = arith.cmpi eq, %arg1, %c3_i32 : i32
    %10 = arith.extui %9 : i1 to i32
    %c0_i32_8 = arith.constant 0 : i32
    %11 = arith.cmpi ne, %10, %c0_i32_8 : i32
    scf.if %11 {
      %c0_9 = arith.constant 0 : index
      %c0_10 = arith.constant 0 : index
      %12 = vector.load %arg6[%c0_9, %c0_10] : memref<16x128xf32, #tpu.memory_space<vmem>>, vector<16x128xf32>
      %c0_11 = arith.constant 0 : index
      %c0_12 = arith.constant 0 : index
      %13 = vector.load %arg4[%c0_11, %c0_12] : memref<1x128xf32, #tpu.memory_space<vmem>>, vector<1x128xf32>
      %14 = vector.broadcast %13 : vector<1x128xf32> to vector<16x128xf32>
      %15 = arith.addf %12, %14 : vector<16x128xf32>
      %16 = math.tanh %15 : vector<16x128xf32>
      %c0_13 = arith.constant 0 : index
      %c0_14 = arith.constant 0 : index
      %17 = vector.load %arg5[%c0_13, %c0_14] : memref<16x128xf32, #tpu.memory_space<vmem>>, vector<16x128xf32>
      tpu.vector_store %arg5[%c0_13, %c0_14], %16 {strides = array<i32>} : memref<16x128xf32, #tpu.memory_space<vmem>>, vector<16x128xf32>,
    } else {
    }
    return
  }
  func.func @transform_0(%arg0: i32, %arg1: i32) -> (i32, i32) {
    %c0_i32 = arith.constant 0 : i32
    return %arg0, %arg1 : i32, i32
  }
  func.func @transform_1(%arg0: i32, %arg1: i32) -> (i32, i32) {
    %c0_i32 = arith.constant 0 : i32
    %c0_i32_0 = arith.constant 0 : i32
    return %arg1, %c0_i32 : i32, i32
  }
  func.func @transform_2(%arg0: i32, %arg1: i32) -> (i32, i32) {
    %c0_i32 = arith.constant 0 : i32
    %c0_i32_0 = arith.constant 0 : i32
    %c0_i32_1 = arith.constant 0 : i32
    return %c0_i32, %c0_i32_0 : i32, i32
  }
  func.func @transform_3(%arg0: i32, %arg1: i32) -> (i32, i32) {
    %c0_i32 = arith.constant 0 : i32
    %c0_i32_0 = arith.constant 0 : i32
    return %arg0, %c0_i32 : i32, i32
  }
}

</mosaic_0001>

<bundles_post_ra>
// kernel: tpu_custom_call.1
= control target key start
LH: loop header
LB: loop body
LE: loop exit
PB: predicated region body
PF: predicated region fallthrough
CT: control target
= control target key end

     0   :  { %8 = vsyncpa [#allocation4], 0  ;;  %s1310_s0 = inlined_call_operand.hbm [shape: bf16[16,2048], index: 0, kind: input, shape index: {}]   ;;  %s1311_s1 = inlined_call_operand.hbm [shape: bf16[2048,128], index: 1, kind: input, shape index: {}]   ;;  %s1312_s2 = inlined_call_operand.vmem [shape: f32[1,128], index: 2, kind: input, shape index: {}]   ;;  %s1313_s3 = inlined_call_operand.hbm [shape: f32[16,128], index: 3, kind: output, shape index: {}]  }
   0x1   :  { %10 = vsyncpa [#allocation4 + $0x1], 0 }
   0x2   :  { %11 = vsyncpa [#allocation7], 0 }
   0x3   :  { %13 = vsyncpa [#allocation7 + $0x1], 0 }
   0x4   :  { %14 = vsyncpa [#allocation5], 0  ;;  %s1125_s12 = smov 0   ;;  %s1127_s13 = smov 0  }
   0x5   :  { %s1129_s14 = smov 0   ;;  %s1131_s15 = smov 0  }
   0x6   :  { %s1133_s16 = smov 0   ;;  %s1135_s17 = smov 0  }
   0x7 LB: > { %s736_s18 = sadd.s32 4294967295, %s1092_s17   ;;  %s29_s19 = sadd.s32 1, %s1088_s16  ;;  %s1092_s17 = sphi %s1135_s17, %s20_s17   ;;  %s1088_s16 = sphi %s1133_s16, %s1323_s16   ;;  %s1084_s15 = sphi %s1131_s15, %s1322_s15   ;;  %s1080_s14 = sphi %s1129_s14, %s1321_s14   ;;  %s1076_s13 = sphi %s1127_s13, %s1320_s13   ;;  %s1072_s12 = sphi %s1125_s12, %s1319_s12  }
   0x8   : > { %p30_p0 = scmp.ge.s32.totalorder %s29_s19, 4  ;;  %s41_s20 = sadd.s32 1, %s1080_s14 }
   0x9   : > { %p48_p1 = scmp.ne.s32.totalorder %s1080_s14, %s1076_s13  ;;  %p49_p2 = scmp.eq.s32.totalorder %s1092_s17, 0 }
   0xa   : > { %s1325_s19 = smov (%p30_p0, %s29_s19), 0  ;;  %p54_p4 = scmp.ne.s32.totalorder %s1076_s13, %s1072_s12 }
   0xb   : > { %p1161_p3 = por %p49_p2, %p48_p1  ;;  %s37_s22 = ssub.s32 %s1088_s16, %s1325_s19 }
   0xc   : > { %p55_p5 = scmp.eq.s32.totalorder %s736_s18, 0  ;;  %p39_p6 = scmp.eq.s32.totalorder %s37_s22, 0 }
   0xd   : > { %p852_p8 = scmp.lt.s32.totalorder %s1092_s17, 4  ;;  %s1179_s25 = sand.u32 1, %s1080_s14  }
   0xe   : > { %p1170_p7 = por %p55_p5, %p54_p4  ;;  %s791_s26 = sshll.u32 %s1088_s16, 8 }
   0xf   : > { %s1176_s24 = scalar_select %p39_p6, %s1080_s14, %s41_s20  }
  0x10   : > { %s739_s27 = sshll.u32 %s1179_s25, 5  ;;  %s167_s30 = scalar_lea.hbm %s1310_s0, %s791_s26 }
  0x11   : > { %s158_s4 = scalar_lea.vmem [#allocation3], %s739_s27  ;;  %p1188_p9 = pnand %p852_p8, %p1161_p3 }
  0x12   : > { %s168_s5 = sshll.u32 %s158_s4, 4  ;;  %p745_p10 = scmp.ge.s32.totalorder %s1092_s17, 1  ;;  %s169_s5 = int_to_ptr.vmem [resolvable:$true] %s168_s5 }
  0x13   : > { %s155_s7 = scalar_lea.sflag [#allocation4], %s1179_s25  ;;  %p956_p11 = pneg %p1188_p9 }
  0x14   : > { %s967_s8 = scalar_lea.vmem %s169_s5, 512  ;;  %s1094_s9 = smov [#allocation3]  }
  0x15   : > { %p968_p12 = scmp.ne.s32.totalorder %s169_s5, %s967_s8  ;;  %s972_s10 = sshll.u32 %s1094_s9, 4  ;;  %s973_s10 = int_to_ptr.vmem [resolvable:$false] %s972_s10 }
  0x16   : > { %s974_s11 = scalar_lea.vmem %s973_s10, 1024  ;;  %p975_p1 = scmp.lt.s32.totalorder %s169_s5, %s973_s10 }
  0x17   : > { %p970_p13 = pnand %p968_p12, %p956_p11  ;;  %p976_p2 = scmp.lt.s32.totalorder %s974_s11, %s967_s8 }
  0x19   : > { %p971_p0 = pneg %p970_p13  ;;  %p977_p3 = por %p976_p2, %p975_p1 }
  0x1b   : > { %p978_p4 = pnand %p977_p3, %p971_p0 }
  0x1d   : > { %981 = shalt.err (!%p978_p4)
}
  0x1e   : > { %s1095_s12 = smov 1024   ;;  %s1096_s20 = smov 256  }
  0x1f   : > { %s1097_s21 = smov 16   ;;  %p197_p5 = scmp.lt.s32.totalorder %s1092_s17, 5 }
  0x20   : > { %848 = dma.hbm_to_vmem [thread:$0]  (!%p1188_p9), %s167_s30, 512, %s169_s5, %s155_s7, %s1095_s12, %s1096_s20, %s1097_s21  }
  0x21   : > { %s742_s22 = sshll.u32 %s1179_s25, 8  ;;  %s792_s26 = sshll.u32 %s1088_s16, 12 }
  0x22   : > { %p1206_p6 = pnand %p745_p10, %p197_p5  ;;  %s188_s4 = scalar_lea.hbm %s1311_s1, %s792_s26 }
  0x23   : > { %s182_s8 = scalar_lea.vmem [#allocation6], %s742_s22  ;;  %s179_s10 = scalar_lea.sflag [#allocation7], %s1179_s25 }
  0x24   : > { %s189_s9 = sshll.u32 %s182_s8, 4  ;;  %s1098_s30 = smov [#allocation6]   ;;  %s190_s9 = int_to_ptr.vmem [resolvable:$true] %s189_s9 }
  0x25   : > { %s995_s11 = scalar_lea.vmem %s190_s9, 4096  ;;  %s1000_s5 = sshll.u32 %s1098_s30, 4  ;;  %s1001_s5 = int_to_ptr.vmem [resolvable:$false] %s1000_s5 }
  0x26   : > { %p996_p8 = scmp.ne.s32.totalorder %s190_s9, %s995_s11  ;;  %s1002_s7 = scalar_lea.vmem %s1001_s5, 8192 }
  0x27   : > { %p1003_p10 = scmp.lt.s32.totalorder %s190_s9, %s1001_s5  ;;  %p1004_p0 = scmp.lt.s32.totalorder %s1002_s7, %s995_s11 }
  0x28   : > { %p998_p12 = pnand %p996_p8, %p956_p11 }
  0x29   : > { %p1005_p1 = por %p1004_p0, %p1003_p10 }
  0x2a   : > { %p999_p13 = pneg %p998_p12 }
  0x2c   : > { %p1006_p2 = pnand %p1005_p1, %p999_p13 }
  0x2e   : > { %1009 = shalt.err (!%p1006_p2)
}
  0x2f   : > { %s1099_s12 = smov 64   ;;  %s1100_s20 = smov 4  }
  0x30   : > { %851 = dma.hbm_to_vmem [thread:$0]  (!%p1188_p9), %s188_s4, 4096, %s190_s9, %s179_s10, %s1099_s12, %s1099_s12, %s1100_s20  }
  0x31   : > { %201 = sbr.rel (%p1206_p6) target bundleno = 348 (0x15c), region = 32  ;;  %s203_s25 = sand.u32 (!%p1206_p6), 1, %s1076_s13  }
  0x32   : > { %s746_s21 = sshll.u32 (!%p1206_p6), %s203_s25, 5  ;;  %s204_s22 = scalar_lea.sflag (!%p1206_p6), [#allocation4], %s203_s25 }
  0x33   : > { %s1222_s26 = scalar_lea.vmem (!%p1206_p6), [#allocation3], %s746_s21 }
  0x36   : > { %1059 = dma.done.wait (%p1170_p7), %s204_s22, 512  }
  0x37   : > { %1061 = vsyncadd (%p1170_p7), %s204_s22, 4294966784  ;;  %s747_s28 = sshll.u32 %s203_s25, 8  ;;  %s213_s29 = scalar_lea.sflag [#allocation7], %s203_s25 }
  0x38   : > { %s1228_s6 = scalar_lea.vmem [#allocation6], %s747_s28 }
  0x39   : > { %1063 = dma.done.wait (%p1170_p7), %s213_s29, 4096  }
  0x3a   : > { %1065 = vsyncadd (%p1170_p7), %s213_s29, 4294963200  ;;  %p748_p9 = scmp.ne.s32.totalorder %s1084_s15, 0 }
  0x3c   : > { %247 = sbr.rel (%p748_p9) target bundleno = 67 (0x43), region = 44 }
  0x41   : > { %v1101_v0 = vmov 0.0  }
  0x42   : > { %248 = vst [vmem:[#allocation2] sm:$0xff] %v1101_v0  ;;  %249 = vst [vmem:[#allocation2 + $0x8] sm:$0xff] %v1101_v0 }
  0x43 PF: > { %v912_v1 = vld [vmem:[%s1228_s6 + $0x78] sm:$0xff]   ;;  %v916_v5 = vld [vmem:[%s1228_s6 + $0x70] sm:$0xff]   ;;  %v920_v9 = vld [vmem:[%s1228_s6 + $0x68] sm:$0xff]   ;;  %p785_p7 = scmp.ne.s32.totalorder %s1084_s15, 3 }
  0x44   : > { %v913_v2 = vld [vmem:[%s1228_s6 + $0xf8] sm:$0xff]   ;;  %793 = vmatprep.subr.bf16.mxu0 %v912_v1  ;;  %v917_v6 = vld [vmem:[%s1228_s6 + $0xf0] sm:$0xff]   ;;  %v921_v10 = vld [vmem:[%s1228_s6 + $0xe8] sm:$0xff]  }
  0x45   : > { %v914_v3 = vld [vmem:[%s1228_s6 + $0x38] sm:$0xff]   ;;  %815 = vmatprep.subr.bf16.mxu1 %v913_v2  ;;  %v918_v7 = vld [vmem:[%s1228_s6 + $0x30] sm:$0xff]   ;;  %v922_v11 = vld [vmem:[%s1228_s6 + $0x28] sm:$0xff]  }
  0x46   : > { %v915_v4 = vld [vmem:[%s1228_s6 + $0xb8] sm:$0xff]   ;;  %794 = vmatpush3.bf16.msra.mxu0 %v914_v3  ;;  %v919_v8 = vld [vmem:[%s1228_s6 + $0xb0] sm:$0xff]   ;;  %v923_v12 = vld [vmem:[%s1228_s6 + $0xa8] sm:$0xff]  }
  0x47   : > { %816 = vmatpush3.bf16.msra.mxu1 %v915_v4  ;;  %795 = vmatprep.subr.bf16.mxu0 %v916_v5  ;;  %v924_v13 = vld [vmem:[%s1228_s6 + $0x60] sm:$0xff]   ;;  %v928_v17 = vld [vmem:[%s1228_s6 + $0x58] sm:$0xff]   ;;  %v932_v21 = vld [vmem:[%s1228_s6 + $0x50] sm:$0xff]  }
  0x48   : > { %817 = vmatprep.subr.bf16.mxu1 %v917_v6  ;;  %v925_v14 = vld [vmem:[%s1228_s6 + $0xe0] sm:$0xff]   ;;  %v929_v18 = vld [vmem:[%s1228_s6 + $0xd8] sm:$0xff]   ;;  %v933_v22 = vld [vmem:[%s1228_s6 + $0xd0] sm:$0xff]  }
  0x49   : > { %v926_v15 = vld [vmem:[%s1228_s6 + $0x20] sm:$0xff]   ;;  %v930_v19 = vld [vmem:[%s1228_s6 + $0x18] sm:$0xff]   ;;  %v934_v23 = vld [vmem:[%s1228_s6 + $0x10] sm:$0xff]  }
  0x4a   : > { %796 = vmatpush3.bf16.msra.mxu0 %v918_v7  ;;  %v927_v16 = vld [vmem:[%s1228_s6 + $0xa0] sm:$0xff]   ;;  %v931_v20 = vld [vmem:[%s1228_s6 + $0x98] sm:$0xff]   ;;  %v935_v24 = vld [vmem:[%s1228_s6 + $0x90] sm:$0xff]  }
  0x4b   : > { %818 = vmatpush3.bf16.msra.mxu1 %v919_v8  ;;  %797 = vmatprep.subr.bf16.mxu0 %v920_v9  ;;  %v936_v25 = vld [vmem:[%s1228_s6 + $0x48] sm:$0xff]   ;;  %v940_v29 = vld [vmem:[%s1228_s6 + $0x40] sm:$0xff]   ;;  %v250_v44 = vld [vmem:[#allocation2] sm:$0xff] }
  0x4c   : > { %819 = vmatprep.subr.bf16.mxu1 %v921_v10  ;;  %v937_v26 = vld [vmem:[%s1228_s6 + $0xc8] sm:$0xff]   ;;  %v941_v30 = vld [vmem:[%s1228_s6 + $0xc0] sm:$0xff]   ;;  %v251_v52 = vld [vmem:[#allocation2 + $0x8] sm:$0xff] }
  0x4d   : > { %v938_v27 = vld [vmem:[%s1228_s6 + $0x8] sm:$0xff]   ;;  %v942_v31 = vld [vmem:[%s1228_s6] sm:$0xff]  }
  0x4e   : > { %798 = vmatpush3.bf16.msra.mxu0 %v922_v11  ;;  %v939_v28 = vld [vmem:[%s1228_s6 + $0x88] sm:$0xff]   ;;  %v943_v32 = vld [vmem:[%s1228_s6 + $0x80] sm:$0xff]  }
  0x4f   : > { %820 = vmatpush3.bf16.msra.mxu1 %v923_v12  ;;  %799 = vmatprep.subr.bf16.mxu0 %v924_v13  ;;  %v944_v33 = vld [vmem:[%s1222_s26] ss:$16 sps:$4 sm:$0xff]   ;;  %v946_v34 = vld [vmem:[%s1222_s26 + $0x4] ss:$16 sps:$4 sm:$0xff]   ;;  %v947_v35 = vld [vmem:[%s1222_s26 + $0x8] ss:$16 sps:$4 sm:$0xff]  }
  0x50   : > { %821 = vmatprep.subr.bf16.mxu1 %v925_v14  ;;  %v949_v36 = vld [vmem:[%s1222_s26 + $0xc] ss:$16 sps:$4 sm:$0xff]   ;;  %564 = vmatprep.mubr.bf16.mxu0 %v946_v34 }
  0x51   : > { %605 = vmatprep.mubr.bf16.mxu1 %v949_v36 }
  0x52   : > { %800 = vmatpush3.bf16.msra.mxu0 %v926_v15 }
  0x53   : > { %822 = vmatpush3.bf16.msra.mxu1 %v927_v16  ;;  %801 = vmatprep.subr.bf16.mxu0 %v928_v17 }
  0x54   : > { %823 = vmatprep.subr.bf16.mxu1 %v929_v18 }
  0x56   : > { %802 = vmatpush3.bf16.msra.mxu0 %v930_v19 }
  0x57   : > { %824 = vmatpush3.bf16.msra.mxu1 %v931_v20  ;;  %803 = vmatprep.subr.bf16.mxu0 %v932_v21 }
  0x58   : > { %825 = vmatprep.subr.bf16.mxu1 %v933_v22 }
  0x5a   : > { %804 = vmatpush3.bf16.msra.mxu0 %v934_v23 }
  0x5b   : > { %826 = vmatpush3.bf16.msra.mxu1 %v935_v24  ;;  %805 = vmatprep.subr.bf16.mxu0 %v936_v25 }
  0x5c   : > { %827 = vmatprep.subr.bf16.mxu1 %v937_v26 }
  0x5e   : > { %806 = vmatpush3.bf16.msra.mxu0 %v938_v27 }
  0x5f   : > { %828 = vmatpush3.bf16.msra.mxu1 %v939_v28  ;;  %807 = vmatprep.subr.bf16.mxu0 %v940_v29 }
  0x60   : > { %829 = vmatprep.subr.bf16.mxu1 %v941_v30 }
  0x62   : > { %808 = vmatpush3.bf16.msra.mxu0 %v942_v31 }
  0x63   : > { %830 = vmatpush3.bf16.msra.mxu1 %v943_v32 }
  0x65   : > { %565 = vmatmul.mubr.bf16.vlgmr.msra.gmra.mxu0 %v944_v33 }
  0x66   : > { %606 = vmatmul.mubr.bf16.vlgmr.msra.gmra.mxu1 %v947_v35 }
 0x125   : > { %v809_v37 = vpop.f32.mrf.mxu0 }
 0x126   : > { %v831_v38 = vpop.f32.mrf.mxu1 }
 0x127   : > { %v810_v39 = vpop.f32.mrf.mxu0 }
 0x128   : > { %v811_v40 = vadd.f32 %v810_v39, %v809_v37  ;;  %v832_v41 = vpop.f32.mrf.mxu1 }
 0x129   : > { %v833_v42 = vadd.f32 %v832_v41, %v831_v38  ;;  %v812_v43 = vpop.f32.mrf.mxu0 }
 0x12a   : > { %v834_v45 = vpop.f32.mrf.mxu1 }
 0x12b   : > { %v608_v46 = vadd.f32 %v833_v42, %v811_v40  ;;  %v813_v47 = vpop.f32.mrf.mxu0 }
 0x12c   : > { %v814_v48 = vadd.f32 %v813_v47, %v812_v43  ;;  %v835_v49 = vpop.f32.mrf.mxu1 }
 0x12d   : > { %v614_v50 = vadd.f32 %v608_v46, %v250_v44  ;;  %v836_v51 = vadd.f32 %v835_v49, %v834_v45 }
 0x12f   : > { %616 = vst [vmem:[#allocation2] sm:$0xff] %v614_v50  ;;  %v611_v53 = vadd.f32 %v836_v51, %v814_v48  ;;  %621 = sbr.rel (%p785_p7) target bundleno = 332 (0x14c), region = 48 }
 0x131   : > { %v615_v54 = vadd.f32 %v611_v53, %v251_v52 }
 0x133   : > { %617 = vst [vmem:[#allocation2 + $0x8] sm:$0xff] %v615_v54 }
 0x134   : > { %v786_v56 = vld [vmem:[%s1312_s2] ss:$0 sm:$0xff] }
 0x136   : > { %v622_v55 = vld [vmem:[#allocation2] sm:$0xff] }
 0x137   : > { %v631_v58 = vadd.f32 %v786_v56, %v622_v55 }
 0x139   : > { %950 = vtanh.f32 %v631_v58 }
 0x13a   : > { %v623_v57 = vld [vmem:[#allocation2 + $0x8] sm:$0xff] }
 0x13b   : > { %v632_v59 = vadd.f32 %v786_v56, %v623_v57 }
 0x13d   : > { %952 = vtanh.f32 %v632_v59 }
 0x146   : > { %v951_v60 = vpop.eup %950 }
 0x147   : > { %635 = vst [vmem:[#allocation8] sm:$0xff] %v951_v60 }
 0x14a   : > { %v953_v61 = vpop.eup %952 }
 0x14b   : > { %636 = vst [vmem:[#allocation8 + $0x8] sm:$0xff] %v953_v61 }
 0x14c PF: > { %p1277_p11 = scmp.eq.s32.totalorder %s736_s18, 3  ;;  %s1102_s4 = smov [#allocation8]  }
 0x14d   : > { %s646_s8 = sshll.u32 %s1102_s4, 4  ;;  %s647_s8 = int_to_ptr.vmem [resolvable:$true] %s646_s8 }
 0x14e   : > { %s1010_s9 = scalar_lea.vmem %s647_s8, 256  ;;  %p1017_p6 = scmp.lt.s32.totalorder %s647_s8, %s647_s8 }
 0x14f   : > { %p1011_p3 = scmp.ne.s32.totalorder %s647_s8, %s1010_s9  ;;  %p1018_p8 = scmp.lt.s32.totalorder %s1010_s9, %s1010_s9 }
 0x151   : > { %p1012_p4 = pnand %p1011_p3, %p1277_p11  ;;  %p1019_p12 = por %p1018_p8, %p1017_p6 }
 0x153   : > { %p1013_p5 = pneg %p1012_p4 }
 0x155   : > { %p1020_p13 = pnand %p1019_p12, %p1013_p5 }
 0x157   : > { %1023 = shalt.err (!%p1020_p13)
}
 0x158   : > { %s1103_s10 = smov 128   ;;  %s1104_s18 = smov 8  }
 0x159   : > { %842 = dma.vmem_to_hbm [thread:$0]  (%p1277_p11), %s647_s8, 256, %s1313_s3, [#allocation5], %s1103_s10, %s1103_s10, %s1104_s18  }
 0x15a   : > { %1067 = dma.done.wait (%p1277_p11), [#allocation5], 256  }
 0x15b   : > { %1069 = vsyncadd (%p1277_p11), [#allocation5], 4294967040 }
 0x15c PF: > { %s20_s17 = sadd.s32 1, %s1092_s17   ;;  %s1319_s12 = smov %s1076_s13 }
 0x15d   : > { %p17_p10 = scmp.ge.s32.totalorder %s20_s17, 6   ;;  %s1320_s13 = smov %s1080_s14 }
 0x15e   : > { %s1321_s14 = smov %s1176_s24  ;;  %s1322_s15 = smov %s1088_s16 }
 0x15f   : > { %s1323_s16 = smov %s1325_s19  ;;  %19 = sbr.rel (!%p17_p10) target bundleno = 7 (0x7), region = 91 }
 0x164   :  { %662 = vsyncpa [#allocation4], 1 }
 0x165   :  { %664 = vsyncpa [#allocation4 + $0x1], 1 }
 0x166   :  { %665 = vsyncpa [#allocation7], 1 }
 0x167   :  { %667 = vsyncpa [#allocation7 + $0x1], 1 }
 0x168   :  { %668 = vsyncpa [#allocation5], 1 }
 0x169   :  { %670 = vsyncpa [#allocation5 + $0x1], 1 }

</bundles_post_ra>
